<compile_context>
chip_gen: v5e
topology: v5e:2x2
jax: 0.10.0
libtpu: 0.0.40
codegen_flags: <defaults>
</compile_context>

<pallas_src>
from functools import partial

import jax
import jax.numpy as jnp
from jax.experimental import pallas as pl
from jax.experimental.pallas import tpu as pltpu


def mlp1_kernel(E_ref, p_ref, out_ref):
    """E_ref: (batch, 1); p_ref: (2, 144, 128); out_ref: (batch, 128).

    Param slab layout (zero-padded past the valid width):
      p[0,   0:128, :] : w1 (Linear(64,64) weight) zero-padded to (128,128)
      p[1,   0:128, :] : w2 (Linear(64,output_dim) weight) zero-padded to (128,128)
      p[0, 128:136, :] : wE (Linear(1,64) weight) replicated across 8 sublanes
      p[0, 136:144, :] : bE replicated across 8 sublanes
      p[1, 128:136, :] : b1 replicated across 8 sublanes
      p[1, 136:144, :] : b2 replicated across 8 sublanes
    """
    batch = E_ref.shape[0]
    relu = lambda x: jnp.maximum(x, 0.0)

    if batch == 8:
        # One f32 sublane tile: use the pre-replicated (8,128) rows directly
        # (no sublane broadcast needed on the VPU path).
        wE = p_ref[0, 128:136, :]
        bE = p_ref[0, 136:144, :]
        b1 = p_ref[1, 128:136, :]
        b2 = p_ref[1, 136:144, :]
    else:
        # Generic fallback: single-row loads, broadcast along sublanes.
        wE = p_ref[0, 128:129, :]
        bE = p_ref[0, 136:137, :]
        b1 = p_ref[1, 128:129, :]
        b2 = p_ref[1, 136:137, :]

    # fc_E1: Linear(1, 64) == broadcast multiply on the VPU (no K=1 MXU matmul).
    # Padded lanes (>=64) stay exactly 0 because wE/bE are zero there.
    x_E1 = relu(E_ref[...] * wE + bE)                              # (batch, 128)

    # fc1: (batch,128) @ (128,128) on the MXU; zero-padded rows/cols keep the
    # extra lanes at 0 after the bias add + relu.  Weight load placed adjacent
    # to its dot so only one 128x128 operand is live at a time.
    h = relu(jnp.dot(x_E1, p_ref[0, 0:128, :],
                     preferred_element_type=jnp.float32) + b1)

    # fc2: (batch,128) @ (128,128); only the first output_dim lanes are valid.
    out = jnp.dot(h, p_ref[1, 0:128, :],
                  preferred_element_type=jnp.float32) + b2
    out_ref[...] = out.astype(out_ref.dtype)


def pack_params(params, output_dim):
    """Pack all parameters into ONE lane-dense (2, 144, 128) f32 slab.

    Called once at parameter-creation time (hoisted out of the per-call path).
    """
    assert params["w1"].shape == (64, 64), "fc1 must be Linear(64, 64)"
    assert params["w2"].shape[0] == 64, "fc2 must take a 64-wide input"
    assert output_dim <= 128, "packing assumes output_dim <= 128"

    slab = jnp.zeros((2, 144, 128), jnp.float32)
    # Weight matrices (tile-aligned, full [m, 0:128, :] slices).
    slab = slab.at[0, 0:64, 0:64].set(params["w1"])                 # (64, 64)
    slab = slab.at[1, 0:64, 0:output_dim].set(params["w2"])         # (64, output_dim)
    # Vector params, replicated across 8 sublanes for the batch==8 fast path.
    slab = slab.at[0, 128:136, 0:64].set(jnp.broadcast_to(params["wE"], (8, 64)))
    slab = slab.at[0, 136:144, 0:64].set(jnp.broadcast_to(params["bE"], (8, 64)))
    slab = slab.at[1, 128:136, 0:64].set(jnp.broadcast_to(params["b1"], (8, 64)))
    slab = slab.at[1, 136:144, 0:output_dim].set(
        jnp.broadcast_to(params["b2"], (8, output_dim)))
    return slab


@partial(jax.jit, static_argnames="output_dim")
def mlp1_forward(E, param_slab, output_dim):
    """Jitted forward: one pallas_call + lane slice, single dispatch."""
    batch = E.shape[0]
    vmem = pltpu.MemorySpace.VMEM
    out_padded = pl.pallas_call(
        mlp1_kernel,
        out_shape=jax.ShapeDtypeStruct((batch, 128), jnp.float32),
        in_specs=[pl.BlockSpec(memory_space=vmem),
                  pl.BlockSpec(memory_space=vmem)],
        out_specs=pl.BlockSpec(memory_space=vmem),
    )(E, param_slab)
    # Lane-dense kernel output; slice to the real output width (fused by jit).
    return out_padded[:, :output_dim]


def _init_linear(key, fan_in, fan_out):
    """PyTorch-style uniform(-1/sqrt(fan_in), 1/sqrt(fan_in)); W stored (in, out)."""
    kw, kb = jax.random.split(key)
    bound = 1.0 / jnp.sqrt(jnp.float32(fan_in))
    w = jax.random.uniform(kw, (fan_in, fan_out), jnp.float32, -bound, bound)
    b = jax.random.uniform(kb, (1, fan_out), jnp.float32, -bound, bound)
    return w, b


def make_params(output_dim, key):
    keys = jax.random.split(key, 3)
    p = {}
    p["wE"], p["bE"] = _init_linear(keys[0], 1, 64)            # fc_E1: Linear(1, 64)
    p["w1"], p["b1"] = _init_linear(keys[1], 64, 64)           # fc1:   Linear(64, 64)
    p["w2"], p["b2"] = _init_linear(keys[2], 64, output_dim)   # fc2:   Linear(64, output_dim)
    return p


def mlp1_reference(E, p):
    relu = lambda x: jnp.maximum(x, 0.0)
    x_E1 = relu(E @ p["wE"] + p["bE"])
    x = relu(x_E1 @ p["w1"] + p["b1"])
    return x @ p["w2"] + p["b2"]


if __name__ == "__main__":
    batch = 8
    output_dim = 16

    key = jax.random.PRNGKey(0)
    k_in, k_par = jax.random.split(key)
    kA, kB, kC, kD, kE, kF, kG, kH, kI = jax.random.split(k_in, 9)

    # A, B, C, D, F, G, H, I exist in the PyTorch signature but are unused by forward().
    A = jax.random.normal(kA, (batch, 1), jnp.float32)
    B = jax.random.normal(kB, (batch, 1), jnp.float32)
    C = jax.random.normal(kC, (batch, 1), jnp.float32)
    D = jax.random.normal(kD, (batch, 1), jnp.float32)
    E = jax.random.normal(kE, (batch, 1), jnp.float32)
    F = jax.random.normal(kF, (batch, 1), jnp.float32)
    G = jax.random.normal(kG, (batch, 1), jnp.float32)
    H = jax.random.normal(kH, (batch, 1), jnp.float32)
    I = jax.random.normal(kI, (batch, 1), jnp.float32)

    params = make_params(output_dim, k_par)
    # Pack ONCE at parameter creation time (not per forward call).
    param_slab = jax.block_until_ready(pack_params(params, output_dim))

    out = mlp1_forward(E, param_slab, output_dim)
    out = jax.block_until_ready(out)

    ref = mlp1_reference(E, params)
    assert out.shape == (batch, output_dim)
    assert jnp.allclose(out, ref, atol=1e-4, rtol=1e-4)

    print("KERNEL_OK")
</pallas_src>

<mosaic_0001>
module attributes {stable_mosaic.version = 11 : i64} {
  func.func @mlp1_kernel(%arg0: memref<8x1xf32, #tpu.memory_space<vmem>>, %arg1: memref<2x144x128xf32, #tpu.memory_space<vmem>>, %arg2: memref<8x128xf32, #tpu.memory_space<vmem>>) attributes {dimension_semantics = [], scalar_prefetch = 0 : i64, scratch_operands = 0 : i64, tpu.core_type = #tpu.core_type<tc>} {
    %c0 = arith.constant 0 : index
    %c128 = arith.constant 128 : index
    %c0_0 = arith.constant 0 : index
    %0 = vector.load %arg1[%c0, %c128, %c0_0] : memref<2x144x128xf32, #tpu.memory_space<vmem>>, vector<1x8x128xf32>
    %1 = vector.shape_cast %0 : vector<1x8x128xf32> to vector<8x128xf32>
    %c0_1 = arith.constant 0 : index
    %c136 = arith.constant 136 : index
    %c0_2 = arith.constant 0 : index
    %2 = vector.load %arg1[%c0_1, %c136, %c0_2] : memref<2x144x128xf32, #tpu.memory_space<vmem>>, vector<1x8x128xf32>
    %3 = vector.shape_cast %2 : vector<1x8x128xf32> to vector<8x128xf32>
    %c1 = arith.constant 1 : index
    %c128_3 = arith.constant 128 : index
    %c0_4 = arith.constant 0 : index
    %4 = vector.load %arg1[%c1, %c128_3, %c0_4] : memref<2x144x128xf32, #tpu.memory_space<vmem>>, vector<1x8x128xf32>
    %5 = vector.shape_cast %4 : vector<1x8x128xf32> to vector<8x128xf32>
    %c1_5 = arith.constant 1 : index
    %c136_6 = arith.constant 136 : index
    %c0_7 = arith.constant 0 : index
    %6 = vector.load %arg1[%c1_5, %c136_6, %c0_7] : memref<2x144x128xf32, #tpu.memory_space<vmem>>, vector<1x8x128xf32>
    %7 = vector.shape_cast %6 : vector<1x8x128xf32> to vector<8x128xf32>
    %c0_8 = arith.constant 0 : index
    %c0_9 = arith.constant 0 : index
    %8 = vector.load %arg0[%c0_8, %c0_9] : memref<8x1xf32, #tpu.memory_space<vmem>>, vector<8x1xf32>
    %9 = vector.broadcast %8 : vector<8x1xf32> to vector<8x128xf32>
    %10 = arith.mulf %9, %1 : vector<8x128xf32>
    %11 = arith.addf %10, %3 : vector<8x128xf32>
    %cst = arith.constant 0.000000e+00 : f32
    %12 = vector.broadcast %cst : f32 to vector<8x128xf32>
    %13 = arith.maximumf %11, %12 : vector<8x128xf32>
    %c0_10 = arith.constant 0 : index
    %c0_11 = arith.constant 0 : index
    %c0_12 = arith.constant 0 : index
    %14 = vector.load %arg1[%c0_10, %c0_11, %c0_12] : memref<2x144x128xf32, #tpu.memory_space<vmem>>, vector<1x128x128xf32>
    %15 = vector.shape_cast %14 : vector<1x128x128xf32> to vector<128x128xf32>
    %cst_13 = arith.constant dense<0.000000e+00> : vector<8x128xf32>
    %16 = tpu.matmul %13, %15, %cst_13 {dimension_numbers = #tpu.dot_dimension_numbers<[1], [0], [0], [1], [0, 0, 1, 1], [], []>} : vector<8x128xf32>, vector<128x128xf32>, vector<8x128xf32> -> vector<8x128xf32>
    %17 = arith.addf %16, %5 : vector<8x128xf32>
    %cst_14 = arith.constant 0.000000e+00 : f32
    %18 = vector.broadcast %cst_14 : f32 to vector<8x128xf32>
    %19 = arith.maximumf %17, %18 : vector<8x128xf32>
    %c1_15 = arith.constant 1 : index
    %c0_16 = arith.constant 0 : index
    %c0_17 = arith.constant 0 : index
    %20 = vector.load %arg1[%c1_15, %c0_16, %c0_17] : memref<2x144x128xf32, #tpu.memory_space<vmem>>, vector<1x128x128xf32>
    %21 = vector.shape_cast %20 : vector<1x128x128xf32> to vector<128x128xf32>
    %cst_18 = arith.constant dense<0.000000e+00> : vector<8x128xf32>
    %22 = tpu.matmul %19, %21, %cst_18 {dimension_numbers = #tpu.dot_dimension_numbers<[1], [0], [0], [1], [0, 0, 1, 1], [], []>} : vector<8x128xf32>, vector<128x128xf32>, vector<8x128xf32> -> vector<8x128xf32>
    %23 = arith.addf %22, %7 : vector<8x128xf32>
    %c0_19 = arith.constant 0 : index
    %c0_20 = arith.constant 0 : index
    %24 = vector.load %arg2[%c0_19, %c0_20] : memref<8x128xf32, #tpu.memory_space<vmem>>, vector<8x128xf32>
    tpu.vector_store %arg2[%c0_19, %c0_20], %23 {strides = array<i32>} : memref<8x128xf32, #tpu.memory_space<vmem>>, vector<8x128xf32>,
    return
  }
}

</mosaic_0001>

<bundles_post_ra>
// kernel: mlp1_forward.1
= control target key start
LH: loop header
LB: loop body
LE: loop exit
PB: predicated region body
PF: predicated region fallthrough
CT: control target
= control target key end

     0   :  { %7 = vsyncpa [#allocation3], 0  ;;  %s220_s0 = inlined_call_operand.vmem [shape: f32[8,1], index: 0, kind: input, shape index: {}]   ;;  %s221_s1 = inlined_call_operand.hbm [shape: f32[2,144,128], index: 1, kind: input, shape index: {}]   ;;  %s222_s2 = inlined_call_operand.hbm [shape: f32[8,128], index: 2, kind: output, shape index: {}]  }
   0x1   :  { %8 = vsyncpa [#allocation4], 0  ;;  %s15_s11 = sshll.u32 %s221_s1, 4  ;;  %s191_s12 = smov [#allocation2]   ;;  %s16_s11 = int_to_ptr.hbm [resolvable:$true] %s15_s11 }
   0x2   :  { %s17_s13 = sshll.u32 %s191_s12, 4  ;;  %s192_s14 = smov 128   ;;  %s18_s13 = int_to_ptr.vmem [resolvable:$true] %s17_s13 }
   0x3   :  { %s193_s15 = smov 8  }
   0x4   :  { %23 = dma.hbm_to_vmem [thread:$0]  %s16_s11, 4608, %s18_s13, [#allocation3], %s192_s14, %s192_s14, %s193_s15  }
   0x5   :  { %187 = dma.done.wait [#allocation3], 4608  }
   0x6   :  { %188 = vsyncadd [#allocation3], 4294962688  ;;  %v194_v0 = vmov 0   ;;  %v33_v1 = vld [vmem:[%s220_s0] sm:$0xff]  ;;  %v57_v2 = vld [vmem:[#allocation2 + $0x78] sm:$0xff]  ;;  %s195_s0 = smov [#allocation5]  }
   0x7   :  { %138 = vset.pattern.permute.xlu0 %v194_v0  ;;  %v56_v3 = vld [vmem:[#allocation2 + $0x70] sm:$0xff]  ;;  %58 = vmatpush.msra.mxu0 %v57_v2  ;;  %v55_v4 = vld [vmem:[#allocation2 + $0x68] sm:$0xff]  ;;  %v54_v5 = vld [vmem:[#allocation2 + $0x60] sm:$0xff]  ;;  %s121_s1 = sshll.u32 %s195_s0, 4  ;;  %s123_s20 = sshll.u32 %s222_s2, 4  ;;  %s122_s1 = int_to_ptr.vmem [resolvable:$true] %s121_s1  ;;  %s124_s20 = int_to_ptr.hbm [resolvable:$true] %s123_s20 }
   0x8   :  { %36 = vperm.xlu0 %138, %v33_v1   ;;  %v53_v6 = vld [vmem:[#allocation2 + $0x58] sm:$0xff]  ;;  %v52_v7 = vld [vmem:[#allocation2 + $0x50] sm:$0xff]  ;;  %v51_v8 = vld [vmem:[#allocation2 + $0x48] sm:$0xff] }
   0x9   :  { %59 = vmatpush.msra.mxu0 %v56_v3  ;;  %v50_v9 = vld [vmem:[#allocation2 + $0x40] sm:$0xff]  ;;  %v49_v10 = vld [vmem:[#allocation2 + $0x38] sm:$0xff]  ;;  %v48_v11 = vld [vmem:[#allocation2 + $0x30] sm:$0xff] }
   0xa   :  { %v47_v12 = vld [vmem:[#allocation2 + $0x28] sm:$0xff]  ;;  %v46_v13 = vld [vmem:[#allocation2 + $0x20] sm:$0xff]  ;;  %v45_v14 = vld [vmem:[#allocation2 + $0x18] sm:$0xff] }
   0xb   :  { %60 = vmatpush.msra.mxu0 %v55_v4  ;;  %v44_v15 = vld [vmem:[#allocation2 + $0x10] sm:$0xff]  ;;  %v43_v16 = vld [vmem:[#allocation2 + $0x8] sm:$0xff]  ;;  %v42_v17 = vld [vmem:[#allocation2] sm:$0xff] }
   0xc   :  { %v94_v18 = vld [vmem:[#allocation2 + $0x108] sm:$0xff]  ;;  %v93_v19 = vld [vmem:[#allocation2 + $0x100] sm:$0xff]  ;;  %v92_v20 = vld [vmem:[#allocation2 + $0xf8] sm:$0xff] }
   0xd   :  { %61 = vmatpush.msra.mxu0 %v54_v5  ;;  %95 = vmatpush.msra.mxu1 %v94_v18  ;;  %v91_v21 = vld [vmem:[#allocation2 + $0xf0] sm:$0xff]  ;;  %v90_v22 = vld [vmem:[#allocation2 + $0xe8] sm:$0xff]  ;;  %v89_v23 = vld [vmem:[#allocation2 + $0xe0] sm:$0xff] }
   0xe   :  { %v88_v24 = vld [vmem:[#allocation2 + $0xd8] sm:$0xff]  ;;  %v87_v25 = vld [vmem:[#allocation2 + $0xd0] sm:$0xff]  ;;  %v86_v26 = vld [vmem:[#allocation2 + $0xc8] sm:$0xff] }
   0xf   :  { %62 = vmatpush.msra.mxu0 %v53_v6  ;;  %96 = vmatpush.msra.mxu1 %v93_v19  ;;  %v85_v27 = vld [vmem:[#allocation2 + $0xc0] sm:$0xff]  ;;  %v84_v28 = vld [vmem:[#allocation2 + $0xb8] sm:$0xff]  ;;  %v83_v29 = vld [vmem:[#allocation2 + $0xb0] sm:$0xff] }
  0x10   :  { %v82_v30 = vld [vmem:[#allocation2 + $0xa8] sm:$0xff]  ;;  %v28_v31 = vld [vmem:[#allocation2 + $0x80] sm:$0xff]  ;;  %v80_v38 = vld [vmem:[#allocation2 + $0x98] sm:$0xff] }
  0x11   :  { %63 = vmatpush.msra.mxu0 %v52_v7  ;;  %97 = vmatpush.msra.mxu1 %v92_v20  ;;  %v29_v33 = vld [vmem:[#allocation2 + $0x88] sm:$0xff]  ;;  %v81_v37 = vld [vmem:[#allocation2 + $0xa0] sm:$0xff]  ;;  %v79_v39 = vld [vmem:[#allocation2 + $0x90] sm:$0xff] }
  0x12   :  { %v31_v40 = vld [vmem:[#allocation2 + $0x110] sm:$0xff]  ;;  %v32_v44 = vld [vmem:[#allocation2 + $0x118] sm:$0xff] }
  0x13   :  { %64 = vmatpush.msra.mxu0 %v51_v8  ;;  %98 = vmatpush.msra.mxu1 %v91_v21 }
  0x15   :  { %65 = vmatpush.msra.mxu0 %v50_v9  ;;  %99 = vmatpush.msra.mxu1 %v90_v22 }
  0x17   :  { %66 = vmatpush.msra.mxu0 %v49_v10  ;;  %100 = vmatpush.msra.mxu1 %v89_v23 }
  0x19   :  { %67 = vmatpush.msra.mxu0 %v48_v11  ;;  %101 = vmatpush.msra.mxu1 %v88_v24 }
  0x1b   :  { %68 = vmatpush.msra.mxu0 %v47_v12  ;;  %102 = vmatpush.msra.mxu1 %v87_v25 }
  0x1d   :  { %69 = vmatpush.msra.mxu0 %v46_v13  ;;  %103 = vmatpush.msra.mxu1 %v86_v26 }
  0x1f   :  { %70 = vmatpush.msra.mxu0 %v45_v14  ;;  %104 = vmatpush.msra.mxu1 %v85_v27 }
  0x21   :  { %71 = vmatpush.msra.mxu0 %v44_v15  ;;  %105 = vmatpush.msra.mxu1 %v84_v28 }
  0x23   :  { %72 = vmatpush.msra.mxu0 %v43_v16  ;;  %106 = vmatpush.msra.mxu1 %v83_v29 }
  0x25   :  { %73 = vmatpush.msra.mxu0 %v42_v17  ;;  %107 = vmatpush.msra.mxu1 %v82_v30 }
  0x27   :  { %108 = vmatpush.msra.mxu1 %v81_v37 }
  0x29   :  { %109 = vmatpush.msra.mxu1 %v80_v38 }
  0x2b   :  { %110 = vmatpush.msra.mxu1 %v79_v39 }
  0x7a   :  { %v37_v32 = vpop.permute.xlu0 %36 }
  0x7b   :  { %v39_v34 = vmul.f32 %v37_v32, %v28_v31 }
  0x7d   :  { %v40_v35 = vadd.f32 %v39_v34, %v29_v33 }
  0x7f   :  { %v41_v36 = vmax.f32 %v40_v35, 0.0 }
  0x81   :  { %74 = vmatmul.f32.vlgmr.msra.gmra.mxu0 %v41_v36 }
  0xfe   :  { %v75_v41 = vpop.f32.mrf.mxu0 }
  0xff   :  { %v76_v42 = vadd.f32 %v75_v41, %v31_v40 }
 0x101   :  { %v78_v43 = vmax.f32 %v76_v42, 0.0 }
 0x103   :  { %111 = vmatmul.f32.vlgmr.msra.gmra.mxu1 %v78_v43 }
 0x180   :  { %v112_v45 = vpop.f32.mrf.mxu1 }
 0x181   :  { %v113_v46 = vadd.f32 %v112_v45, %v32_v44 }
 0x183   :  { %115 = vst [vmem:[#allocation5] sm:$0xff] %v113_v46 }
 0x184   :  { %126 = dma.vmem_to_hbm [thread:$0]  %s122_s1, 128, %s124_s20, [#allocation4]  }
 0x185   :  { %189 = dma.done.wait [#allocation4], 128  }
 0x186   :  { %190 = vsyncadd [#allocation4], 4294967168 }
 0x187   :  { %131 = vsyncpa [#allocation3], 1 }
 0x188   :  { %132 = vsyncpa [#allocation4], 1 }

</bundles_post_ra>
